<compile_context>
chip_gen: v7x
topology: tpu7x:2x2x1
jax: 0.10.0
libtpu: 0.0.40
codegen_flags: <defaults>
</compile_context>

<pallas_src>
import functools

import jax
import jax.numpy as jnp
from jax.experimental import pallas as pl
from jax.experimental.pallas import tpu as pltpu

EPS = 1e-5  # PyTorch LayerNorm default


def _normed_conv_kernel(x_ref, w_ref, b_ref, g_ref, beta_ref, o_ref, *,
                        k, wp, l_ext, w_valid, hw_valid):
    # One batch sample per grid step.
    #   x_ref:    (C_in, L_in_pad)   bf16  geo-padded sample, flat row-major (row stride = wp)
    #   w_ref:    (k*k, C_out, C_in) bf16  conv taps (tap-major)
    #   b_ref:    (C_out, 1)         f32   conv bias
    #   g_ref:    (C_out, l_ext)     f32   LayerNorm gamma, extended (stride-wp) layout
    #   beta_ref: (C_out, l_ext)     f32   LayerNorm beta,  extended layout
    #   o_ref:    (C_out, l_ext)     f32   output, extended layout (halo columns are junk)
    #
    # Fused im2col: accumulate the k*k taps as shifted matmuls on the VMEM tile,
    # so no k^2-inflated patches array ever touches HBM.
    acc = jnp.zeros(o_ref.shape, jnp.float32)
    for di in range(k):
        for dj in range(k):
            off = di * wp + dj
            xs = x_ref[:, off:off + l_ext]                       # (C_in, l_ext) bf16
            acc = acc + jnp.dot(w_ref[di * k + dj], xs,
                                preferred_element_type=jnp.float32)
    y = acc + b_ref[...]                                         # conv bias (pre-norm)

    # GlobalNorm: LayerNorm over ALL of (C_out, H, W) for this sample (biased var,
    # eps inside the sqrt -> matches PyTorch).  Valid (non-halo) columns are the
    # lanes with (lane index mod wp) < W; junk columns are masked from the stats
    # and discarded by the wrapper slice.
    lane = jax.lax.broadcasted_iota(jnp.int32, y.shape, 1)
    valid = (lane % wp) < w_valid
    ym = jnp.where(valid, y, 0.0)
    inv_n = 1.0 / (o_ref.shape[0] * hw_valid)
    s = jnp.sum(ym)                                              # sum over valid points
    q = jnp.sum(ym * y)                                          # sum of squares over valid points
    mean = s * inv_n
    var = q * inv_n - mean * mean                                # single-pass, f32, O(1) values
    inv = jax.lax.rsqrt(var + EPS)
    o_ref[...] = (y - mean) * inv * g_ref[...] + beta_ref[...]


def geo_cyclic_pad(x, p):
    # TODO(synk): GeoCyclicPadding source was not provided; assuming the standard geo
    # padding: pole rows mirrored with a 180-degree longitude roll (roll period = the
    # UNPADDED width W, applied before adding the longitude halo), then circular
    # padding in longitude.
    _, _, _, W = x.shape
    top = jnp.roll(x[:, :, :p, :], W // 2, axis=-1)[:, :, ::-1, :]
    bot = jnp.roll(x[:, :, -p:, :], W // 2, axis=-1)[:, :, ::-1, :]
    x_lat = jnp.concatenate([top, x, bot], axis=2)               # (B, C, H+2p, W)
    return jnp.concatenate([x_lat[..., -p:], x_lat, x_lat[..., :p]], axis=-1)


def normed_conv(x, conv_w, conv_b, gamma, beta, *, kernel_size):
    """x: (B, C_in, H, W) NCHW; conv_w: (C_out, C_in, k, k) OIHW; gamma/beta: (C_out, H, W)."""
    B, C_in, H, W = x.shape
    C_out = conv_w.shape[0]
    k = kernel_size
    p = k // 2
    Hp, Wp = H + 2 * p, W + 2 * p
    L_ext = H * Wp                          # extended output length (row stride Wp)
    L_in = Hp * Wp + 2 * p                  # taps read up to index Hp*Wp + 2p - 1
    L_in_pad = ((L_in + 127) // 128) * 128  # lane-align the flat input

    # bf16 activations BEFORE the pad chain (pad/slice/reshape are exact in bf16).
    # NOTE: bf16 conv inputs deviate from the f32 PyTorch conv; acceptable if the
    # model tolerates bf16 activation traffic (it halves HBM bytes + hits MXU rate).
    xb = x.astype(jnp.bfloat16)
    xp = geo_cyclic_pad(xb, p) if k > 1 else xb                  # (B, C_in, Hp, Wp)
    x_flat = xp.reshape(B, C_in, Hp * Wp)
    x_flat = jnp.pad(x_flat, ((0, 0), (0, 0), (0, L_in_pad - Hp * Wp)))

    # Conv weight as a tap-major stack (k*k, C_out, C_in): tiny, one-time.
    w_stack = conv_w.transpose(2, 3, 0, 1).reshape(k * k, C_out, C_in).astype(jnp.bfloat16)
    b_col = conv_b.reshape(C_out, 1).astype(jnp.float32)

    # gamma/beta in the extended (row stride = Wp) layout; halo columns are dead.
    pad_w = ((0, 0), (0, 0), (0, Wp - W))
    gamma_ext = jnp.pad(gamma.astype(jnp.float32), pad_w).reshape(C_out, L_ext)
    beta_ext = jnp.pad(beta.astype(jnp.float32), pad_w).reshape(C_out, L_ext)

    kern = functools.partial(_normed_conv_kernel, k=k, wp=Wp, l_ext=L_ext,
                             w_valid=W, hw_valid=H * W)

    flops = 2 * B * C_out * C_in * k * k * H * W
    bytes_accessed = (x_flat.size * 2 + w_stack.size * 2 + b_col.size * 4
                      + gamma_ext.size * 4 + beta_ext.size * 4
                      + B * C_out * L_ext * 4)

    out_ext = pl.pallas_call(
        kern,
        out_shape=jax.ShapeDtypeStruct((B, C_out, L_ext), jnp.float32),
        grid=(B,),
        in_specs=[
            pl.BlockSpec((pl.Squeezed(), C_in, L_in_pad), lambda b: (b, 0, 0)),
            pl.BlockSpec((k * k, C_out, C_in), lambda b: (0, 0, 0)),
            pl.BlockSpec((C_out, 1), lambda b: (0, 0)),
            pl.BlockSpec((C_out, L_ext), lambda b: (0, 0)),
            pl.BlockSpec((C_out, L_ext), lambda b: (0, 0)),
        ],
        out_specs=pl.BlockSpec((pl.Squeezed(), C_out, L_ext), lambda b: (b, 0, 0)),
        compiler_params=pltpu.CompilerParams(
            dimension_semantics=("parallel",),    # one sample per v7x TensorCore
            vmem_limit_bytes=32 * 1024 * 1024,
        ),
        cost_estimate=pl.CostEstimate(
            flops=flops, transcendentals=0, bytes_accessed=bytes_accessed),
    )(x_flat, w_stack, b_col, gamma_ext, beta_ext)

    # Extended (stride-Wp) layout back to NCHW: metadata reshape + one slice copy.
    return out_ext.reshape(B, C_out, H, Wp)[..., :W]


def normed_conv_ref(x, conv_w, conv_b, gamma, beta, *, kernel_size):
    """Pure-JAX f32 reference (geo-padded conv + LayerNorm over (C,H,W))."""
    k = kernel_size
    p = k // 2
    xp = geo_cyclic_pad(x, p) if k > 1 else x
    y = jax.lax.conv_general_dilated(
        xp, conv_w, window_strides=(1, 1), padding="VALID",
        dimension_numbers=("NCHW", "OIHW", "NCHW"))
    y = y + conv_b.reshape(1, -1, 1, 1)
    mean = y.mean(axis=(1, 2, 3), keepdims=True)
    var = ((y - mean) ** 2).mean(axis=(1, 2, 3), keepdims=True)
    yn = (y - mean) / jnp.sqrt(var + EPS)
    return yn * gamma[None] + beta[None]


if __name__ == "__main__":
    B, C_in, C_out, H, W, K = 2, 4, 8, 16, 16, 3  # mesh_size = (16, 16)

    key = jax.random.PRNGKey(0)
    kx, kw, kb, kg, kbe = jax.random.split(key, 5)

    x = jax.random.normal(kx, (B, C_in, H, W), jnp.float32)
    fan_in = C_in * K * K
    conv_w = jax.random.normal(kw, (C_out, C_in, K, K), jnp.float32) / jnp.sqrt(fan_in)
    conv_b = 0.1 * jax.random.normal(kb, (C_out,), jnp.float32)
    # GlobalNorm creates per-point scale/bias of shape (C_out, H, W)
    gamma = 1.0 + 0.1 * jax.random.normal(kg, (C_out, H, W), jnp.float32)
    beta = 0.1 * jax.random.normal(kbe, (C_out, H, W), jnp.float32)

    out = normed_conv(x, conv_w, conv_b, gamma, beta, kernel_size=K)
    out = jax.block_until_ready(out)
    assert out.shape == (B, C_out, H, W)

    ref = normed_conv_ref(x, conv_w, conv_b, gamma, beta, kernel_size=K)
    err = float(jnp.max(jnp.abs(out - ref)))
    # bf16 matmul operands vs f32 reference -> loosened tolerance (values are O(1)).
    assert jnp.allclose(out, ref, atol=5e-2, rtol=5e-2), err

    print("KERNEL_OK")
</pallas_src>

<mosaic_0001>
module attributes {stable_mosaic.version = 11 : i64} {
  func.func @_normed_conv_kernel(%arg0: i32, %arg1: memref<1x4x384xbf16, #tpu.memory_space<vmem>>, %arg2: memref<9x8x4xbf16, #tpu.memory_space<vmem>>, %arg3: memref<8x1xf32, #tpu.memory_space<vmem>>, %arg4: memref<8x288xf32, #tpu.memory_space<vmem>>, %arg5: memref<8x288xf32, #tpu.memory_space<vmem>>, %arg6: memref<1x8x288xf32, #tpu.memory_space<vmem>>) attributes {dimension_semantics = [#tpu.dimension_semantics<parallel>], iteration_bounds = array<i64: 2>, scalar_prefetch = 0 : i64, scratch_operands = 0 : i64, tpu.core_type = #tpu.core_type<tc>, window_params = [{transform_indices = @transform_0, window_bounds = array<i64: 1, 4, 384>}, {pipeline_mode = #tpu.pipeline_mode<synchronous>, transform_indices = @transform_1, window_bounds = array<i64: 9, 8, 4>}, {pipeline_mode = #tpu.pipeline_mode<synchronous>, transform_indices = @transform_2, window_bounds = array<i64: 8, 1>}, {pipeline_mode = #tpu.pipeline_mode<synchronous>, transform_indices = @transform_3, window_bounds = array<i64: 8, 288>}, {pipeline_mode = #tpu.pipeline_mode<synchronous>, transform_indices = @transform_4, window_bounds = array<i64: 8, 288>}, {transform_indices = @transform_5, window_bounds = array<i64: 1, 8, 288>}]} {
    %cst = arith.constant 0.000000e+00 : f32
    %0 = vector.broadcast %cst : f32 to vector<8x288xf32>
    %c0 = arith.constant 0 : index
    %c0_0 = arith.constant 0 : index
    %c0_1 = arith.constant 0 : index
    %1 = vector.load %arg1[%c0, %c0_0, %c0_1] : memref<1x4x384xbf16, #tpu.memory_space<vmem>>, vector<1x4x288xbf16>
    %2 = vector.shape_cast %1 : vector<1x4x288xbf16> to vector<4x288xbf16>
    %c0_2 = arith.constant 0 : index
    %c0_3 = arith.constant 0 : index
    %c0_4 = arith.constant 0 : index
    %3 = vector.load %arg2[%c0_2, %c0_3, %c0_4] : memref<9x8x4xbf16, #tpu.memory_space<vmem>>, vector<1x8x4xbf16>
    %4 = vector.shape_cast %3 : vector<1x8x4xbf16> to vector<8x4xbf16>
    %cst_5 = arith.constant dense<0.000000e+00> : vector<8x288xf32>
    %5 = tpu.matmul %4, %2, %cst_5 {dimension_numbers = #tpu.dot_dimension_numbers<[1], [0], [0], [1], [0, 0, 1, 1], [], []>} : vector<8x4xbf16>, vector<4x288xbf16>, vector<8x288xf32> -> vector<8x288xf32>
    %6 = arith.addf %0, %5 : vector<8x288xf32>
    %c0_6 = arith.constant 0 : index
    %c0_7 = arith.constant 0 : index
    %c1 = arith.constant 1 : index
    %7 = vector.load %arg1[%c0_6, %c0_7, %c1] : memref<1x4x384xbf16, #tpu.memory_space<vmem>>, vector<1x4x288xbf16>
    %8 = vector.shape_cast %7 : vector<1x4x288xbf16> to vector<4x288xbf16>
    %c1_8 = arith.constant 1 : index
    %c0_9 = arith.constant 0 : index
    %c0_10 = arith.constant 0 : index
    %9 = vector.load %arg2[%c1_8, %c0_9, %c0_10] : memref<9x8x4xbf16, #tpu.memory_space<vmem>>, vector<1x8x4xbf16>
    %10 = vector.shape_cast %9 : vector<1x8x4xbf16> to vector<8x4xbf16>
    %cst_11 = arith.constant dense<0.000000e+00> : vector<8x288xf32>
    %11 = tpu.matmul %10, %8, %cst_11 {dimension_numbers = #tpu.dot_dimension_numbers<[1], [0], [0], [1], [0, 0, 1, 1], [], []>} : vector<8x4xbf16>, vector<4x288xbf16>, vector<8x288xf32> -> vector<8x288xf32>
    %12 = arith.addf %6, %11 : vector<8x288xf32>
    %c0_12 = arith.constant 0 : index
    %c0_13 = arith.constant 0 : index
    %c2 = arith.constant 2 : index
    %13 = vector.load %arg1[%c0_12, %c0_13, %c2] : memref<1x4x384xbf16, #tpu.memory_space<vmem>>, vector<1x4x288xbf16>
    %14 = vector.shape_cast %13 : vector<1x4x288xbf16> to vector<4x288xbf16>
    %c2_14 = arith.constant 2 : index
    %c0_15 = arith.constant 0 : index
    %c0_16 = arith.constant 0 : index
    %15 = vector.load %arg2[%c2_14, %c0_15, %c0_16] : memref<9x8x4xbf16, #tpu.memory_space<vmem>>, vector<1x8x4xbf16>
    %16 = vector.shape_cast %15 : vector<1x8x4xbf16> to vector<8x4xbf16>
    %cst_17 = arith.constant dense<0.000000e+00> : vector<8x288xf32>
    %17 = tpu.matmul %16, %14, %cst_17 {dimension_numbers = #tpu.dot_dimension_numbers<[1], [0], [0], [1], [0, 0, 1, 1], [], []>} : vector<8x4xbf16>, vector<4x288xbf16>, vector<8x288xf32> -> vector<8x288xf32>
    %18 = arith.addf %12, %17 : vector<8x288xf32>
    %c0_18 = arith.constant 0 : index
    %c0_19 = arith.constant 0 : index
    %c18 = arith.constant 18 : index
    %19 = vector.load %arg1[%c0_18, %c0_19, %c18] : memref<1x4x384xbf16, #tpu.memory_space<vmem>>, vector<1x4x288xbf16>
    %20 = vector.shape_cast %19 : vector<1x4x288xbf16> to vector<4x288xbf16>
    %c3 = arith.constant 3 : index
    %c0_20 = arith.constant 0 : index
    %c0_21 = arith.constant 0 : index
    %21 = vector.load %arg2[%c3, %c0_20, %c0_21] : memref<9x8x4xbf16, #tpu.memory_space<vmem>>, vector<1x8x4xbf16>
    %22 = vector.shape_cast %21 : vector<1x8x4xbf16> to vector<8x4xbf16>
    %cst_22 = arith.constant dense<0.000000e+00> : vector<8x288xf32>
    %23 = tpu.matmul %22, %20, %cst_22 {dimension_numbers = #tpu.dot_dimension_numbers<[1], [0], [0], [1], [0, 0, 1, 1], [], []>} : vector<8x4xbf16>, vector<4x288xbf16>, vector<8x288xf32> -> vector<8x288xf32>
    %24 = arith.addf %18, %23 : vector<8x288xf32>
    %c0_23 = arith.constant 0 : index
    %c0_24 = arith.constant 0 : index
    %c19 = arith.constant 19 : index
    %25 = vector.load %arg1[%c0_23, %c0_24, %c19] : memref<1x4x384xbf16, #tpu.memory_space<vmem>>, vector<1x4x288xbf16>
    %26 = vector.shape_cast %25 : vector<1x4x288xbf16> to vector<4x288xbf16>
    %c4 = arith.constant 4 : index
    %c0_25 = arith.constant 0 : index
    %c0_26 = arith.constant 0 : index
    %27 = vector.load %arg2[%c4, %c0_25, %c0_26] : memref<9x8x4xbf16, #tpu.memory_space<vmem>>, vector<1x8x4xbf16>
    %28 = vector.shape_cast %27 : vector<1x8x4xbf16> to vector<8x4xbf16>
    %cst_27 = arith.constant dense<0.000000e+00> : vector<8x288xf32>
    %29 = tpu.matmul %28, %26, %cst_27 {dimension_numbers = #tpu.dot_dimension_numbers<[1], [0], [0], [1], [0, 0, 1, 1], [], []>} : vector<8x4xbf16>, vector<4x288xbf16>, vector<8x288xf32> -> vector<8x288xf32>
    %30 = arith.addf %24, %29 : vector<8x288xf32>
    %c0_28 = arith.constant 0 : index
    %c0_29 = arith.constant 0 : index
    %c20 = arith.constant 20 : index
    %31 = vector.load %arg1[%c0_28, %c0_29, %c20] : memref<1x4x384xbf16, #tpu.memory_space<vmem>>, vector<1x4x288xbf16>
    %32 = vector.shape_cast %31 : vector<1x4x288xbf16> to vector<4x288xbf16>
    %c5 = arith.constant 5 : index
    %c0_30 = arith.constant 0 : index
    %c0_31 = arith.constant 0 : index
    %33 = vector.load %arg2[%c5, %c0_30, %c0_31] : memref<9x8x4xbf16, #tpu.memory_space<vmem>>, vector<1x8x4xbf16>
    %34 = vector.shape_cast %33 : vector<1x8x4xbf16> to vector<8x4xbf16>
    %cst_32 = arith.constant dense<0.000000e+00> : vector<8x288xf32>
    %35 = tpu.matmul %34, %32, %cst_32 {dimension_numbers = #tpu.dot_dimension_numbers<[1], [0], [0], [1], [0, 0, 1, 1], [], []>} : vector<8x4xbf16>, vector<4x288xbf16>, vector<8x288xf32> -> vector<8x288xf32>
    %36 = arith.addf %30, %35 : vector<8x288xf32>
    %c0_33 = arith.constant 0 : index
    %c0_34 = arith.constant 0 : index
    %c36 = arith.constant 36 : index
    %37 = vector.load %arg1[%c0_33, %c0_34, %c36] : memref<1x4x384xbf16, #tpu.memory_space<vmem>>, vector<1x4x288xbf16>
    %38 = vector.shape_cast %37 : vector<1x4x288xbf16> to vector<4x288xbf16>
    %c6 = arith.constant 6 : index
    %c0_35 = arith.constant 0 : index
    %c0_36 = arith.constant 0 : index
    %39 = vector.load %arg2[%c6, %c0_35, %c0_36] : memref<9x8x4xbf16, #tpu.memory_space<vmem>>, vector<1x8x4xbf16>
    %40 = vector.shape_cast %39 : vector<1x8x4xbf16> to vector<8x4xbf16>
    %cst_37 = arith.constant dense<0.000000e+00> : vector<8x288xf32>
    %41 = tpu.matmul %40, %38, %cst_37 {dimension_numbers = #tpu.dot_dimension_numbers<[1], [0], [0], [1], [0, 0, 1, 1], [], []>} : vector<8x4xbf16>, vector<4x288xbf16>, vector<8x288xf32> -> vector<8x288xf32>
    %42 = arith.addf %36, %41 : vector<8x288xf32>
    %c0_38 = arith.constant 0 : index
    %c0_39 = arith.constant 0 : index
    %c37 = arith.constant 37 : index
    %43 = vector.load %arg1[%c0_38, %c0_39, %c37] : memref<1x4x384xbf16, #tpu.memory_space<vmem>>, vector<1x4x288xbf16>
    %44 = vector.shape_cast %43 : vector<1x4x288xbf16> to vector<4x288xbf16>
    %c7 = arith.constant 7 : index
    %c0_40 = arith.constant 0 : index
    %c0_41 = arith.constant 0 : index
    %45 = vector.load %arg2[%c7, %c0_40, %c0_41] : memref<9x8x4xbf16, #tpu.memory_space<vmem>>, vector<1x8x4xbf16>
    %46 = vector.shape_cast %45 : vector<1x8x4xbf16> to vector<8x4xbf16>
    %cst_42 = arith.constant dense<0.000000e+00> : vector<8x288xf32>
    %47 = tpu.matmul %46, %44, %cst_42 {dimension_numbers = #tpu.dot_dimension_numbers<[1], [0], [0], [1], [0, 0, 1, 1], [], []>} : vector<8x4xbf16>, vector<4x288xbf16>, vector<8x288xf32> -> vector<8x288xf32>
    %48 = arith.addf %42, %47 : vector<8x288xf32>
    %c0_43 = arith.constant 0 : index
    %c0_44 = arith.constant 0 : index
    %c38 = arith.constant 38 : index
    %49 = vector.load %arg1[%c0_43, %c0_44, %c38] : memref<1x4x384xbf16, #tpu.memory_space<vmem>>, vector<1x4x288xbf16>
    %50 = vector.shape_cast %49 : vector<1x4x288xbf16> to vector<4x288xbf16>
    %c8 = arith.constant 8 : index
    %c0_45 = arith.constant 0 : index
    %c0_46 = arith.constant 0 : index
    %51 = vector.load %arg2[%c8, %c0_45, %c0_46] : memref<9x8x4xbf16, #tpu.memory_space<vmem>>, vector<1x8x4xbf16>
    %52 = vector.shape_cast %51 : vector<1x8x4xbf16> to vector<8x4xbf16>
    %cst_47 = arith.constant dense<0.000000e+00> : vector<8x288xf32>
    %53 = tpu.matmul %52, %50, %cst_47 {dimension_numbers = #tpu.dot_dimension_numbers<[1], [0], [0], [1], [0, 0, 1, 1], [], []>} : vector<8x4xbf16>, vector<4x288xbf16>, vector<8x288xf32> -> vector<8x288xf32>
    %54 = arith.addf %48, %53 : vector<8x288xf32>
    %c0_48 = arith.constant 0 : index
    %c0_49 = arith.constant 0 : index
    %55 = vector.load %arg3[%c0_48, %c0_49] : memref<8x1xf32, #tpu.memory_space<vmem>>, vector<8x1xf32>
    %56 = vector.broadcast %55 : vector<8x1xf32> to vector<8x288xf32>
    %57 = arith.addf %54, %56 : vector<8x288xf32>
    %58 = tpu.iota {dimensions = array<i32: 1>} : vector<8x288xi32>
    %c18_i32 = arith.constant 18 : i32
    %c0_i32 = arith.constant 0 : i32
    %59 = arith.cmpi eq, %c18_i32, %c0_i32 : i32
    %c1_i32 = arith.constant 1 : i32
    %60 = arith.select %59, %c1_i32, %c18_i32 : i32
    %61 = vector.broadcast %60 : i32 to vector<8x288xi32>
    %62 = arith.remsi %58, %61 : vector<8x288xi32>
    %c0_i32_50 = arith.constant 0 : i32
    %63 = vector.broadcast %c0_i32_50 : i32 to vector<8x288xi32>
    %64 = arith.cmpi ne, %62, %63 : vector<8x288xi32>
    %c0_i32_51 = arith.constant 0 : i32
    %65 = vector.broadcast %c0_i32_51 : i32 to vector<8x288xi32>
    %66 = arith.cmpi slt, %62, %65 : vector<8x288xi32>
    %c0_i32_52 = arith.constant 0 : i32
    %67 = arith.cmpi slt, %60, %c0_i32_52 : i32
    %68 = vector.broadcast %67 : i1 to vector<8x288xi1>
    %69 = vector.broadcast %68 : vector<8x288xi1> to vector<8x288xi1>
    %70 = arith.xori %66, %69 : vector<8x288xi1>
    %71 = arith.andi %70, %64 : vector<8x288xi1>
    %72 = vector.broadcast %60 : i32 to vector<8x288xi32>
    %73 = arith.addi %62, %72 : vector<8x288xi32>
    %74 = arith.select %71, %73, %62 : vector<8x288xi1>, vector<8x288xi32>
    %c16_i32 = arith.constant 16 : i32
    %75 = vector.broadcast %c16_i32 : i32 to vector<8x288xi32>
    %76 = arith.cmpi slt, %74, %75 : vector<8x288xi32>
    %cst_53 = arith.constant 0.000000e+00 : f32
    %77 = vector.broadcast %cst_53 : f32 to vector<8x288xf32>
    %78 = arith.select %76, %57, %77 : vector<8x288xi1>, vector<8x288xf32>
    %79 = vector.shape_cast %78 : vector<8x288xf32> to vector<1x8x288xf32>
    %cst_54 = arith.constant dense<0.000000e+00> : vector<1xf32>
    %80 = vector.multi_reduction <add>, %79, %cst_54 [1, 2] : vector<1x8x288xf32> to vector<1xf32>
    %81 = vector.shape_cast %80 : vector<1xf32> to vector<1x1x1xf32>
    %82 = vector.extract %81[0, 0, 0] : f32 from vector<1x1x1xf32>
    %83 = arith.mulf %78, %57 : vector<8x288xf32>
    %84 = vector.shape_cast %83 : vector<8x288xf32> to vector<1x8x288xf32>
    %cst_55 = arith.constant dense<0.000000e+00> : vector<1xf32>
    %85 = vector.multi_reduction <add>, %84, %cst_55 [1, 2] : vector<1x8x288xf32> to vector<1xf32>
    %86 = vector.shape_cast %85 : vector<1xf32> to vector<1x1x1xf32>
    %87 = vector.extract %86[0, 0, 0] : f32 from vector<1x1x1xf32>
    %cst_56 = arith.constant 4.8828125E-4 : f32
    %88 = arith.mulf %82, %cst_56 : f32
    %cst_57 = arith.constant 4.8828125E-4 : f32
    %89 = arith.mulf %87, %cst_57 : f32
    %90 = arith.mulf %88, %88 : f32
    %91 = arith.subf %89, %90 : f32
    %cst_58 = arith.constant 9.99999974E-6 : f32
    %92 = arith.addf %91, %cst_58 : f32
    %93 = math.rsqrt %92 : f32
    %94 = vector.broadcast %88 : f32 to vector<8x288xf32>
    %95 = arith.subf %57, %94 : vector<8x288xf32>
    %96 = vector.broadcast %93 : f32 to vector<8x288xf32>
    %97 = arith.mulf %95, %96 : vector<8x288xf32>
    %c0_59 = arith.constant 0 : index
    %c0_60 = arith.constant 0 : index
    %98 = vector.load %arg4[%c0_59, %c0_60] : memref<8x288xf32, #tpu.memory_space<vmem>>, vector<8x288xf32>
    %99 = arith.mulf %97, %98 : vector<8x288xf32>
    %c0_61 = arith.constant 0 : index
    %c0_62 = arith.constant 0 : index
    %100 = vector.load %arg5[%c0_61, %c0_62] : memref<8x288xf32, #tpu.memory_space<vmem>>, vector<8x288xf32>
    %101 = arith.addf %99, %100 : vector<8x288xf32>
    %c0_63 = arith.constant 0 : index
    %c0_64 = arith.constant 0 : index
    %c0_65 = arith.constant 0 : index
    %102 = vector.load %arg6[%c0_63, %c0_64, %c0_65] : memref<1x8x288xf32, #tpu.memory_space<vmem>>, vector<1x8x288xf32>
    %103 = vector.shape_cast %102 : vector<1x8x288xf32> to vector<8x288xf32>
    %104 = vector.shape_cast %101 : vector<8x288xf32> to vector<1x8x288xf32>
    tpu.vector_store %arg6[%c0_63, %c0_64, %c0_65], %104 {strides = array<i32>} : memref<1x8x288xf32, #tpu.memory_space<vmem>>, vector<1x8x288xf32>,
    return
  }
  func.func @transform_0(%arg0: i32) -> (i32, i32, i32) {
    %c0_i32 = arith.constant 0 : i32
    %c0_i32_0 = arith.constant 0 : i32
    %c0_i32_1 = arith.constant 0 : i32
    return %arg0, %c0_i32, %c0_i32_0 : i32, i32, i32
  }
  func.func @transform_1(%arg0: i32) -> (i32, i32, i32) {
    %c0_i32 = arith.constant 0 : i32
    %c0_i32_0 = arith.constant 0 : i32
    %c0_i32_1 = arith.constant 0 : i32
    %c0_i32_2 = arith.constant 0 : i32
    return %c0_i32, %c0_i32_0, %c0_i32_1 : i32, i32, i32
  }
  func.func @transform_2(%arg0: i32) -> (i32, i32) {
    %c0_i32 = arith.constant 0 : i32
    %c0_i32_0 = arith.constant 0 : i32
    %c0_i32_1 = arith.constant 0 : i32
    return %c0_i32, %c0_i32_0 : i32, i32
  }
  func.func @transform_3(%arg0: i32) -> (i32, i32) {
    %c0_i32 = arith.constant 0 : i32
    %c0_i32_0 = arith.constant 0 : i32
    %c0_i32_1 = arith.constant 0 : i32
    return %c0_i32, %c0_i32_0 : i32, i32
  }
  func.func @transform_4(%arg0: i32) -> (i32, i32) {
    %c0_i32 = arith.constant 0 : i32
    %c0_i32_0 = arith.constant 0 : i32
    %c0_i32_1 = arith.constant 0 : i32
    return %c0_i32, %c0_i32_0 : i32, i32
  }
  func.func @transform_5(%arg0: i32) -> (i32, i32, i32) {
    %c0_i32 = arith.constant 0 : i32
    %c0_i32_0 = arith.constant 0 : i32
    %c0_i32_1 = arith.constant 0 : i32
    return %arg0, %c0_i32, %c0_i32_0 : i32, i32, i32
  }
}

</mosaic_0001>

<bundles_post_ra>
// kernel: tpu_custom_call.1
= control target key start
LH: loop header
LB: loop body
LE: loop exit
PB: predicated region body
PF: predicated region fallthrough
CT: control target
= control target key end

     0   :  { %10 = vsyncpa [#allocation3], 0  ;;  %s2134_s0 = inlined_call_operand.vmem [shape: bf16[2,4,384], index: 0, kind: input, shape index: {}]   ;;  %s2135_s1 = inlined_call_operand.vmem [shape: bf16[9,8,4], index: 1, kind: input, shape index: {}]   ;;  %s2136_s2 = inlined_call_operand.vmem [shape: f32[8,1], index: 2, kind: input, shape index: {}]   ;;  %s2137_s3 = inlined_call_operand.vmem [shape: f32[8,288], index: 3, kind: input, shape index: {}]   ;;  %s2138_s4 = inlined_call_operand.vmem [shape: f32[8,288], index: 4, kind: input, shape index: {}]   ;;  %s2139_s5 = inlined_call_operand.hbm [shape: f32[2,8,288], index: 5, kind: output, shape index: {}]  }
   0x1   :  { %12 = vsyncpa [#allocation3 + $0x1], 0  ;;  %s1816_s18 = smov 0   ;;  %s1818_s19 = smov 0  }
   0x2   :  { %s1820_s20 = smov 0   ;;  %s1822_s21 = smov 0  }
   0x3 LB: > { %s1837_s22 = sadd.s32 4294967295, %s1771_s21   ;;  %s1517_s23 = sadd.s32 4294967294, %s1771_s21   ;;  %s1771_s21 = sphi %s1822_s21, %s2151_s21   ;;  %s1767_s20 = sphi %s1820_s20, %s2150_s20   ;;  %s1763_s19 = sphi %s1818_s19, %s2149_s19   ;;  %s1759_s18 = sphi %s1816_s18, %s2148_s18  }
   0x4   : > { %s1841_s24 = sadd.s32 1, %s1771_s21   ;;  %s135_s25 = sadd.s32 1, %s1767_s20 }
   0x5   : > { %s132_s26 = ssub.s32 %s1771_s21, %s1841_s24  ;;  %p145_p0 = scmp.ne.s32.totalorder %s1767_s20, %s1763_s19 }
   0x6   : > { %p133_p1 = scmp.eq.s32.totalorder %s132_s26, 0  ;;  %p146_p2 = scmp.eq.s32.totalorder %s1837_s22, 1 }
   0x7   : > { %p151_p3 = scmp.ne.s32.totalorder %s1763_s19, %s1759_s18  ;;  %p152_p4 = scmp.eq.s32.totalorder %s1517_s23, 1 }
   0x8   : > { %s1852_s27 = scalar_select %p133_p1, %s1767_s20, %s135_s25  }
   0x9   : > { %p1854_p5 = por %p146_p2, %p145_p0  ;;  %p1858_p6 = por %p152_p4, %p151_p3 }
   0xa   : > { %p1520_p7 = scmp.ge.s32.totalorder %s1771_s21, 1  ;;  %p190_p8 = scmp.lt.s32.totalorder %s1771_s21, 3 }
   0xc   : > { %p191_p9 = pnand %p1520_p7, %p190_p8 }
   0xd   : > { %p218_p10 = scmp.lt.s32.totalorder (!%p191_p9), %s1837_s22, 1  ;;  %v233_v0 = vlaneseq (!%p191_p9)  ;;  %v1773_v1 = vmov (!%p191_p9), 1983009808   ;;  %v1774_v3 = vmov (!%p191_p9), 0.0   ;;  %vm1775_vm0 = vmmov (!%p191_p9), 0   ;;  %s1777_s10 = smov (!%p191_p9), 127  }
   0xe   : > { %194 = sbr.rel (%p191_p9) target bundleno = 738 (0x2e2), region = 40  ;;  %v231_v2 = vunpack.c.l.s4 (!%p191_p9), %v1773_v1  ;;  %1578 = vmatprep.subr.bf16.mxu1 (!%p191_p9), %v1774_v3  ;;  %1580 = vmatprep.mubr.msk.bf16.mxu1 (!%p191_p9), %vm1775_vm0, %v1774_v3  ;;  %v1776_v6 = vmov (!%p191_p9), 0   ;;  %s1778_s11 = smov (!%p191_p9), 126   ;;  %v1317_v48 = vld [vmem:[%s2136_s2] sm:$0xff] (!%p191_p9)  ;;  %vm258_vm1 = vcmask (!%p191_p9), 1041408   ;;  %vm251_vm2 = vcmask (!%p191_p9), 1039360  }
   0xf   : > { %v234_v4 = vshrl.u32 (!%p191_p9), %v233_v0, 7  ;;  %300 = vmatprep.mubr.bf16.mxu0 (!%p191_p9), %v1776_v6  ;;  %1698 = vset.pattern.permute.xlu0 (!%p191_p9), %v1776_v6  ;;  %s1779_s12 = smov (!%p191_p9), 110   ;;  %s1780_s13 = smov (!%p191_p9), 109   ;;  %v1522_v53 = vld [vmem:[%s2135_s1 + $0x4] sm:$0xf] (!%p191_p9)  ;;  %vm254_vm3 = vcmask (!%p191_p9), 31744  }
  0x10   : > { %v232_v5 = vunpack.c.0.s8 (!%p191_p9), %v231_v2  ;;  %s1781_s14 = smov (!%p191_p9), 108   ;;  %s1782_s15 = smov (!%p191_p9), 92   ;;  %vm468_vm4 = vcmask (!%p191_p9), 1031168   ;;  %v225_v63 = vld [vmem:[%s2135_s1] sm:$0xf] (!%p191_p9)  ;;  %vm593_vm5 = vcmask (!%p191_p9), 900096  }
  0x11   : > { %s1783_s16 = smov (!%p191_p9), 91   ;;  %s1784_s17 = smov (!%p191_p9), 90   ;;  %vm718_vm6 = vcmask (!%p191_p9), 891904   ;;  %vm843_vm7 = vcmask (!%p191_p9), 883712   ;;  %vm968_vm8 = vcmask (!%p191_p9), 752640   ;;  %vm1093_vm9 = vcmask (!%p191_p9), 744448  }
  0x12   : > { %v1872_v7 = vsub.s32 (!%p191_p9), %v232_v5, %v234_v4  ;;  %vm1218_vm10 = vcmask (!%p191_p9), 736256   ;;  %s1785_s26 = smov (!%p191_p9), [#allocation2]  }
  0x15   : > { %s219_s30 = scalar_select %p218_p10, %s1837_s22, 1 }
  0x17   : > { %s1633_s6 = smul.u32 6, %s219_s30  ;;  %s1713_s30 = sshll.u32 %s1785_s26, 4  ;;  %s1714_s30 = int_to_ptr.vmem [resolvable:$false] %s1713_s30 }
  0x19   : > { %s1877_s9 = scalar_lea.vmem %s2134_s0, %s1633_s6 }
  0x1a   : > { %v224_v8 = vld [vmem:[%s1877_s9] sm:$0x3f] }
  0x1b   : > { %v1881_v9 = vrot.slane %v224_v8, %v1872_v7  ;;  %v229_v10 = vcombine.high %v224_v8, %v224_v8  ;;  %v442_v11 = vld [vmem:[%s1877_s9] sm:$0x3f] }
  0x1c   : > { %v453_v14 = vrot.slane %v442_v11, %v1872_v7  ;;  %v446_v15 = vcombine.high %v442_v11, %v442_v11  ;;  %v567_v17 = vld [vmem:[%s1877_s9] sm:$0x3f]  ;;  %v1529_v11 = vld [vmem:[%s2135_s1 + $0x8] sm:$0xf] }
  0x1d   : > { %245 = vrot.lane.b32.xlu0 %v1881_v9, %s1777_s10  ;;  %v1886_v12 = vrot.slane %v229_v10, %v1872_v7  ;;  %v1890_v13 = vcombine.high %v1881_v9, %v1881_v9  ;;  %v578_v19 = vrot.slane %v567_v17, %v1872_v7  ;;  %v571_v20 = vcombine.high %v567_v17, %v567_v17  ;;  %v692_v22 = vld [vmem:[%s1877_s9] sm:$0x3f] }
  0x1e   : > { %v461_v16 = vcombine.high %v453_v14, %v453_v14  ;;  %v460_v18 = vrot.slane %v446_v15, %v1872_v7  ;;  %v703_v24 = vrot.slane %v692_v22, %v1872_v7  ;;  %v696_v25 = vcombine.high %v692_v22, %v692_v22  ;;  %v817_v27 = vld [vmem:[%s1877_s9] sm:$0x3f] }
  0x1f   : > { %249 = vrot.lane.b32.xlu1 %v1886_v12, %s1777_s10  ;;  %v586_v21 = vcombine.high %v578_v19, %v578_v19  ;;  %v585_v23 = vrot.slane %v571_v20, %v1872_v7  ;;  %v828_v29 = vrot.slane %v817_v27, %v1872_v7  ;;  %v821_v30 = vcombine.high %v817_v27, %v817_v27  ;;  %v942_v32 = vld [vmem:[%s1877_s9] sm:$0x3f]  ;;  %v1533_v20 = vld [vmem:[%s2135_s1 + $0xc] sm:$0xf] }
  0x20   : > { %v711_v26 = vcombine.high %v703_v24, %v703_v24  ;;  %v710_v28 = vrot.slane %v696_v25, %v1872_v7  ;;  %v953_v34 = vrot.slane %v942_v32, %v1872_v7  ;;  %v946_v35 = vcombine.high %v942_v32, %v942_v32  ;;  %v1067_v37 = vld [vmem:[%s1877_s9] sm:$0x3f] }
  0x21   : > { %247 = vrot.lane.b32.xlu0 %v1890_v13, %s1777_s10  ;;  %v836_v31 = vcombine.high %v828_v29, %v828_v29  ;;  %v835_v33 = vrot.slane %v821_v30, %v1872_v7  ;;  %v1078_v39 = vrot.slane %v1067_v37, %v1872_v7  ;;  %v1071_v40 = vcombine.high %v1067_v37, %v1067_v37  ;;  %v1192_v42 = vld [vmem:[%s1877_s9] sm:$0x3f] }
  0x22   : > { %v961_v36 = vcombine.high %v953_v34, %v953_v34  ;;  %v960_v38 = vrot.slane %v946_v35, %v1872_v7  ;;  %v1203_v44 = vrot.slane %v1192_v42, %v1872_v7  ;;  %v1196_v45 = vcombine.high %v1192_v42, %v1192_v42 }
  0x23   : > { %462 = vrot.lane.b32.xlu1 %v453_v14, %s1778_s11  ;;  %v1086_v41 = vcombine.high %v1078_v39, %v1078_v39  ;;  %v1085_v43 = vrot.slane %v1071_v40, %v1872_v7  ;;  %v359_v56 = vsel %vm258_vm1, %v1886_v12, 0  ;;  %v353_v59 = vsel %vm258_vm1, %v1881_v9, 0 }
  0x24   : > { %v1211_v46 = vcombine.high %v1203_v44, %v1203_v44  ;;  %v1210_v47 = vrot.slane %v1196_v45, %v1872_v7 }
  0x25   : > { %464 = vrot.lane.b32.xlu0 %v461_v16, %s1778_s11 }
  0x27   : > { %466 = vrot.lane.b32.xlu1 %v460_v18, %s1778_s11 }
  0x29   : > { %587 = vrot.lane.b32.xlu0 %v578_v19, %s1779_s12 }
  0x2b   : > { %589 = vrot.lane.b32.xlu1 %v586_v21, %s1779_s12 }
  0x2d   : > { %591 = vrot.lane.b32.xlu0 %v585_v23, %s1779_s12 }
  0x2f   : > { %712 = vrot.lane.b32.xlu1 %v703_v24, %s1780_s13 }
  0x31   : > { %714 = vrot.lane.b32.xlu0 %v711_v26, %s1780_s13 }
  0x33   : > { %716 = vrot.lane.b32.xlu1 %v710_v28, %s1780_s13  ;;  %v1537_v28 = vld [vmem:[%s2135_s1 + $0x10] sm:$0xf]  ;;  %s215_s13 = sand.u32 1, %s1763_s19  }
  0x35   : > { %837 = vrot.lane.b32.xlu0 %v828_v29, %s1781_s14 }
  0x37   : > { %839 = vrot.lane.b32.xlu1 %v836_v31, %s1781_s14 }
  0x39   : > { %841 = vrot.lane.b32.xlu0 %v835_v33, %s1781_s14  ;;  %s1632_s14 = smul.u32 24, %s215_s13 }
  0x3b   : > { %962 = vrot.lane.b32.xlu1 %v953_v34, %s1782_s15 }
  0x3d   : > { %964 = vrot.lane.b32.xlu0 %v961_v36, %s1782_s15  ;;  %v1541_v36 = vld [vmem:[%s2135_s1 + $0x14] sm:$0xf] }
  0x3f   : > { %966 = vrot.lane.b32.xlu1 %v960_v38, %s1782_s15 }
  0x41   : > { %1087 = vrot.lane.b32.xlu0 %v1078_v39, %s1783_s16 }
  0x43   : > { %1089 = vrot.lane.b32.xlu1 %v1086_v41, %s1783_s16 }
  0x45   : > { %1091 = vrot.lane.b32.xlu0 %v1085_v43, %s1783_s16  ;;  %v1545_v43 = vld [vmem:[%s2135_s1 + $0x18] sm:$0xf] }
  0x47   : > { %1212 = vrot.lane.b32.xlu1 %v1203_v44, %s1784_s17 }
  0x49   : > { %1214 = vrot.lane.b32.xlu0 %v1211_v46, %s1784_s17 }
  0x4b   : > { %1216 = vrot.lane.b32.xlu1 %v1210_v47, %s1784_s17 }
  0x4d   : > { %1320 = vperm.xlu0 %1698, %v1317_v48  }
  0x8f   : > { %v246_v49 = vpop.permute.xlu0 %245 }
  0x91   : > { %v250_v50 = vpop.permute.xlu1 %249 }
  0x92   : > { %v266_v51 = vsel %vm258_vm1, %v250_v50, 0 }
  0x93   : > { %v248_v52 = vpop.permute.xlu0 %247  ;;  %1579 = vmatpush3.bf16.msra.mxu1 %v266_v51 }
  0x94   : > { %v253_v54 = vsel %vm251_vm2, %v248_v52, %v250_v50  ;;  %v252_v55 = vsel %vm251_vm2, %v246_v49, %v248_v52  ;;  %1584 = vmatprep.subr.bf16.mxu1 %v1774_v3  ;;  %v1549_v50 = vld [vmem:[%s2135_s1 + $0x1c] sm:$0xf] }
  0x95   : > { %1523 = vmatprep.subr.msk.bf16.mxu0 %vm258_vm1, %v253_v54  ;;  %v260_v57 = vsel %vm258_vm1, %v252_v55, 0  ;;  %v463_v58 = vpop.permute.xlu1 %462  ;;  %v1553_v54 = vld [vmem:[%s2135_s1 + $0x20] sm:$0xf] }
  0x96   : > { %269 = vmatpush1.bf16.msra.mxu0 %v260_v57  ;;  %1581 = vmatmul.mubr.msk.bf16.vlgmr.msra.gmra.mrb[0].mxu1 %vm254_vm3, %v1522_v53 }
  0x97   : > { %1526 = vmatprep.subr.msk.bf16.mxu0 %vm258_vm1, %v1890_v13  ;;  %v465_v60 = vpop.permute.xlu0 %464  ;;  %1585 = vmatpush3.bf16.msra.mxu1 %v359_v56 }
  0x98   : > { %1586 = vmatprep.mubr.msk.bf16.mxu1 %vm1775_vm0, %v1774_v3  ;;  %1590 = vmatprep.subr.bf16.mxu1 %v1774_v3  ;;  %v469_v2 = vsel %vm468_vm4, %v463_v58, %v465_v60 }
  0x99   : > { %1524 = vmatmul.mubr.msk.bf16.vlgmr.msra.gmra.mrb[0].mxu0 %vm254_vm3, %v1522_v53  ;;  %v467_v61 = vpop.permute.xlu1 %466  ;;  %v475_v7 = vsel %vm258_vm1, %v469_v2, 0 }
  0x9a   : > { %362 = vmatpush1.bf16.msra.mxu0 %v353_v59  ;;  %v470_v62 = vsel %vm468_vm4, %v465_v60, %v467_v61  ;;  %393 = vmatprep.mubr.bf16.mxu0 %v1776_v6  ;;  %v481_v4 = vsel %vm258_vm1, %v467_v61, 0 }
  0x9b   : > { %1530 = vmatprep.subr.msk.bf16.mxu0 %vm258_vm1, %v470_v62  ;;  %v588_v1 = vpop.permute.xlu0 %587 }
  0x9d   : > { %v590_v5 = vpop.permute.xlu1 %589 }
  0x9e   : > { %1587 = vmatmul.mubr.msk.bf16.vlgmr.msra.gmra.mrb[4].mxu1 %vm254_vm3, %v225_v63  ;;  %v594_v13 = vsel %vm593_vm5, %v588_v1, %v590_v5 }
  0x9f   : > { %1591 = vmatpush3.bf16.msra.mxu1 %v481_v4  ;;  %1592 = vmatprep.mubr.msk.bf16.mxu1 %vm1775_vm0, %v1774_v3  ;;  %v592_v8 = vpop.permute.xlu0 %591  ;;  %v600_v16 = vsel %vm258_vm1, %v594_v13, 0 }
  0xa0   : > { %v595_v9 = vsel %vm593_vm5, %v590_v5, %v592_v8  ;;  %1596 = vmatprep.subr.bf16.mxu1 %v1774_v3  ;;  %v606_v14 = vsel %vm258_vm1, %v592_v8, 0 }
  0xa1   : > { %1527 = vmatmul.mubr.msk.bf16.vlgmr.msra.gmra.mrb[4].mxu0 %vm254_vm3, %v225_v63  ;;  %v713_v10 = vpop.permute.xlu1 %712 }
  0xa2   : > { %484 = vmatpush1.bf16.msra.mxu0 %v475_v7  ;;  %515 = vmatprep.mubr.bf16.mxu0 %v1776_v6 }
  0xa3   : > { %1534 = vmatprep.subr.msk.bf16.mxu0 %vm258_vm1, %v595_v9  ;;  %v715_v12 = vpop.permute.xlu0 %714 }
  0xa4   : > { %v719_v21 = vsel %vm718_vm6, %v713_v10, %v715_v12 }
  0xa5   : > { %v717_v15 = vpop.permute.xlu1 %716  ;;  %v725_v24 = vsel %vm258_vm1, %v719_v21, 0 }
  0xa6   : > { %1593 = vmatmul.mubr.msk.bf16.vlgmr.msra.gmra.mrb[8].mxu1 %vm254_vm3, %v1529_v11  ;;  %v720_v18 = vsel %vm718_vm6, %v715_v12, %v717_v15  ;;  %v731_v22 = vsel %vm258_vm1, %v717_v15, 0 }
  0xa7   : > { %1597 = vmatpush3.bf16.msra.mxu1 %v606_v14  ;;  %1598 = vmatprep.mubr.msk.bf16.mxu1 %vm1775_vm0, %v1774_v3  ;;  %v838_v17 = vpop.permute.xlu0 %837 }
  0xa8   : > { %1602 = vmatprep.subr.bf16.mxu1 %v1774_v3 }
  0xa9   : > { %1531 = vmatmul.mubr.msk.bf16.vlgmr.msra.gmra.mrb[8].mxu0 %vm254_vm3, %v1529_v11  ;;  %v840_v19 = vpop.permute.xlu1 %839 }
  0xaa   : > { %609 = vmatpush1.bf16.msra.mxu0 %v600_v16  ;;  %640 = vmatprep.mubr.bf16.mxu0 %v1776_v6  ;;  %v844_v29 = vsel %vm843_vm7, %v838_v17, %v840_v19 }
  0xab   : > { %1538 = vmatprep.subr.msk.bf16.mxu0 %vm258_vm1, %v720_v18  ;;  %v842_v23 = vpop.permute.xlu0 %841  ;;  %v850_v32 = vsel %vm258_vm1, %v844_v29, 0 }
  0xac   : > { %v845_v26 = vsel %vm843_vm7, %v840_v19, %v842_v23  ;;  %v856_v30 = vsel %vm258_vm1, %v842_v23, 0  ;;  %vm1385_vm7 = vcmask 261120  }
  0xad   : > { %v963_v25 = vpop.permute.xlu1 %962 }
  0xae   : > { %1599 = vmatmul.mubr.msk.bf16.vlgmr.msra.gmra.mrb[12].mxu1 %vm254_vm3, %v1533_v20 }
  0xaf   : > { %1603 = vmatpush3.bf16.msra.mxu1 %v731_v22  ;;  %1604 = vmatprep.mubr.msk.bf16.mxu1 %vm1775_vm0, %v1774_v3  ;;  %v965_v27 = vpop.permute.xlu0 %964 }
  0xb0   : > { %1608 = vmatprep.subr.bf16.mxu1 %v1774_v3  ;;  %v969_v37 = vsel %vm968_vm8, %v963_v25, %v965_v27 }
  0xb1   : > { %1535 = vmatmul.mubr.msk.bf16.vlgmr.msra.gmra.mrb[12].mxu0 %vm254_vm3, %v1533_v20  ;;  %v967_v31 = vpop.permute.xlu1 %966  ;;  %v975_v40 = vsel %vm258_vm1, %v969_v37, 0 }
  0xb2   : > { %734 = vmatpush1.bf16.msra.mxu0 %v725_v24  ;;  %765 = vmatprep.mubr.bf16.mxu0 %v1776_v6  ;;  %v970_v34 = vsel %vm968_vm8, %v965_v27, %v967_v31  ;;  %v981_v38 = vsel %vm258_vm1, %v967_v31, 0 }
  0xb3   : > { %1542 = vmatprep.subr.msk.bf16.mxu0 %vm258_vm1, %v845_v26  ;;  %v1088_v33 = vpop.permute.xlu0 %1087 }
  0xb5   : > { %v1090_v35 = vpop.permute.xlu1 %1089 }
  0xb6   : > { %1605 = vmatmul.mubr.msk.bf16.vlgmr.msra.gmra.mrb[16].mxu1 %vm254_vm3, %v1537_v28  ;;  %v1094_v44 = vsel %vm1093_vm9, %v1088_v33, %v1090_v35  ;;  %v1327_v33 = vand.u32 127, %v233_v0 }
  0xb7   : > { %1609 = vmatpush3.bf16.msra.mxu1 %v856_v30  ;;  %1610 = vmatprep.mubr.msk.bf16.mxu1 %vm1775_vm0, %v1774_v3  ;;  %v1092_v39 = vpop.permute.xlu0 %1091  ;;  %v1100_v48 = vsel %vm258_vm1, %v1094_v44, 0 }
  0xb8   : > { %1614 = vmatprep.subr.bf16.mxu1 %v1774_v3  ;;  %v1095_v42 = vsel %vm1093_vm9, %v1090_v35, %v1092_v39  ;;  %v1106_v45 = vsel %vm258_vm1, %v1092_v39, 0 }
  0xb9   : > { %1539 = vmatmul.mubr.msk.bf16.vlgmr.msra.gmra.mrb[16].mxu0 %vm254_vm3, %v1537_v28  ;;  %v1213_v41 = vpop.permute.xlu1 %1212 }
  0xba   : > { %859 = vmatpush1.bf16.msra.mxu0 %v850_v32  ;;  %890 = vmatprep.mubr.bf16.mxu0 %v1776_v6 }
  0xbb   : > { %1546 = vmatprep.subr.msk.bf16.mxu0 %vm258_vm1, %v970_v34  ;;  %v1215_v46 = vpop.permute.xlu0 %1214 }
  0xbc   : > { %v1219_v51 = vsel %vm1218_vm10, %v1213_v41, %v1215_v46 }
  0xbd   : > { %v1217_v47 = vpop.permute.xlu1 %1216  ;;  %v1225_v53 = vsel %vm258_vm1, %v1219_v51, 0 }
  0xbe   : > { %1611 = vmatmul.mubr.msk.bf16.vlgmr.msra.gmra.mrb[20].mxu1 %vm254_vm3, %v1541_v36  ;;  %v1220_v49 = vsel %vm1218_vm10, %v1215_v46, %v1217_v47  ;;  %v1231_v52 = vsel %vm258_vm1, %v1217_v47, 0 }
  0xbf   : > { %1615 = vmatpush3.bf16.msra.mxu1 %v981_v38  ;;  %1616 = vmatprep.mubr.msk.bf16.mxu1 %vm1775_vm0, %v1774_v3  ;;  %v1329_v38 = vadd.s32 256, %v1327_v33 }
  0xc0   : > { %1620 = vmatprep.subr.bf16.mxu1 %v1774_v3 }
  0xc1   : > { %1543 = vmatmul.mubr.msk.bf16.vlgmr.msra.gmra.mrb[20].mxu0 %vm254_vm3, %v1541_v36 }
  0xc2   : > { %984 = vmatpush1.bf16.msra.mxu0 %v975_v40  ;;  %1015 = vmatprep.mubr.bf16.mxu0 %v1776_v6 }
  0xc3   : > { %1550 = vmatprep.subr.msk.bf16.mxu0 %vm258_vm1, %v1095_v42 }
  0xc6   : > { %1617 = vmatmul.mubr.msk.bf16.vlgmr.msra.gmra.mrb[24].mxu1 %vm254_vm3, %v1545_v43 }
  0xc7   : > { %1621 = vmatpush3.bf16.msra.mxu1 %v1106_v45  ;;  %1622 = vmatprep.mubr.msk.bf16.mxu1 %vm1775_vm0, %v1774_v3  ;;  %v1328_v45 = vadd.s32 128, %v1327_v33 }
  0xc8   : > { %1626 = vmatprep.subr.bf16.mxu1 %v1774_v3 }
  0xc9   : > { %1547 = vmatmul.mubr.msk.bf16.vlgmr.msra.gmra.mrb[24].mxu0 %vm254_vm3, %v1545_v43 }
  0xca   : > { %1109 = vmatpush1.bf16.msra.mxu0 %v1100_v48  ;;  %1140 = vmatprep.mubr.bf16.mxu0 %v1776_v6  ;;  %v2027_v47 = vmul.u32.u64.low 3817748708, %v1329_v38  ;;  %v2028_v48 = vmul.u32.u64.high 3817748708, %v1329_v38, %v2027_v47 }
  0xcb   : > { %1554 = vmatprep.subr.msk.bf16.mxu0 %vm258_vm1, %v1220_v49 }
  0xce   : > { %1623 = vmatmul.mubr.msk.bf16.vlgmr.msra.gmra.mrb[28].mxu1 %vm254_vm3, %v1549_v50 }
  0xcf   : > { %1627 = vmatpush3.bf16.msra.mxu1 %v1231_v52  ;;  %1628 = vmatprep.mubr.msk.bf16.mxu1 %vm1775_vm0, %v1774_v3 }
  0xd1   : > { %1551 = vmatmul.mubr.msk.bf16.vlgmr.msra.gmra.mrb[28].mxu0 %vm254_vm3, %v1549_v50  ;;  %v2030_v50 = vmul.u32.u64.low 3817748708, %v1327_v33  ;;  %v2031_v51 = vmul.u32.u64.high 3817748708, %v1327_v33, %v2030_v50 }
  0xd2   : > { %1234 = vmatpush1.bf16.msra.mxu0 %v1225_v53  ;;  %1265 = vmatprep.mubr.bf16.mxu0 %v1776_v6 }
  0xd6   : > { %1629 = vmatmul.mubr.msk.bf16.vlgmr.msra.gmra.mrb[32].mxu1 %vm254_vm3, %v1553_v54 }
  0xd9   : > { %1555 = vmatmul.mubr.msk.bf16.vlgmr.msra.gmra.mrb[32].mxu0 %vm254_vm3, %v1553_v54  ;;  %v2033_v53 = vmul.u32.u64.low 3817748708, %v1328_v45  ;;  %v2034_v54 = vmul.u32.u64.high 3817748708, %v1328_v45, %v2033_v53 }
 0x169   : > { %v343_v55 = vpop.f32.mrb[0].mxu1 }
 0x16a   : > { %v1582_v56 = vpop.f32.mrb[1].mxu1 }
 0x16b   : > { %v346_v57 = vpop.f32.mrb[2].mxu1 }
 0x16c   : > { %v302_v58 = vpop.f32.mrb[0].mxu0  ;;  %v1583_v59 = vpop.f32.mrb[3].mxu1 }
 0x16d   : > { %v304_v60 = vpop.f32.mrb[1].mxu0 }
 0x16e   : > { %v306_v3 = vpop.f32.mrb[2].mxu0 }
 0x16f   : > { %v307_v61 = vpop.f32.mrb[3].mxu0 }
 0x171   : > { %v436_v62 = vpop.f32.mrb[4].mxu1 }
 0x172   : > { %v437_v63 = vadd.f32 %v436_v62, %v343_v55  ;;  %v1588_v1 = vpop.f32.mrb[5].mxu1  ;;  %v1358_v62 = vshrl.u32 %v2028_v48, 4 }
 0x173   : > { %v439_v6 = vpop.f32.mrb[6].mxu1  ;;  %v1336_v1 = vshrl.u32 %v2031_v51, 4 }
 0x174   : > { %v395_v2 = vpop.f32.mrb[4].mxu0  ;;  %v1589_v4 = vpop.f32.mrb[7].mxu1 }
 0x175   : > { %v396_v5 = vadd.f32 %v395_v2, %v302_v58  ;;  %v397_v7 = vpop.f32.mrb[5].mxu0  ;;  %v1347_v4 = vshrl.u32 %v2034_v54, 4 }
 0x176   : > { %v398_v8 = vadd.f32 %v397_v7, %v304_v60  ;;  %v399_v9 = vpop.f32.mrb[6].mxu0  ;;  %v1359_v7 = vmul.u32 18, %v1358_v62 }
 0x177   : > { %v400_v10 = vpop.f32.mrb[7].mxu0 }
 0x179   : > { %v558_v11 = vpop.f32.mrb[8].mxu1 }
 0x17a   : > { %v566_v12 = vadd.f32 %v558_v11, %v437_v63  ;;  %v1594_v13 = vpop.f32.mrb[9].mxu1 }
 0x17b   : > { %v561_v14 = vpop.f32.mrb[10].mxu1 }
 0x17c   : > { %v517_v15 = vpop.f32.mrb[8].mxu0  ;;  %v1595_v16 = vpop.f32.mrb[11].mxu1 }
 0x17d   : > { %v564_v17 = vadd.f32 %v517_v15, %v396_v5  ;;  %v519_v18 = vpop.f32.mrb[9].mxu0  ;;  %v1348_v15 = vmul.u32 18, %v1347_v4 }
 0x17e   : > { %v565_v19 = vadd.f32 %v519_v18, %v398_v8  ;;  %v521_v20 = vpop.f32.mrb[10].mxu0 }
 0x17f   : > { %v522_v21 = vpop.f32.mrb[11].mxu0 }
 0x181   : > { %v683_v22 = vpop.f32.mrb[12].mxu1 }
 0x182   : > { %v691_v23 = vadd.f32 %v683_v22, %v566_v12  ;;  %v1600_v24 = vpop.f32.mrb[13].mxu1  ;;  %v1337_v12 = vmul.u32 18, %v1336_v1  ;;  %v1349_v22 = vsub.s32 %v1328_v45, %v1348_v15 }
 0x183   : > { %v686_v25 = vpop.f32.mrb[14].mxu1 }
 0x184   : > { %v642_v26 = vpop.f32.mrb[12].mxu0  ;;  %v1601_v27 = vpop.f32.mrb[15].mxu1  ;;  %vm1364_vm15 = vcmp.ne.s32.totalorder %v1349_v22, 0  ;;  %vm1367_vm0 = vcmp.lt.s32.totalorder %v1349_v22, 0 }
 0x185   : > { %v689_v28 = vadd.f32 %v642_v26, %v564_v17  ;;  %v644_v29 = vpop.f32.mrb[13].mxu0  ;;  %v1360_v17 = vsub.s32 %v1329_v38, %v1359_v7  ;;  %vm2047_vm3 = vmand %vm1367_vm0, %vm1364_vm15 }
 0x186   : > { %v690_v30 = vadd.f32 %v644_v29, %v565_v19  ;;  %v646_v31 = vpop.f32.mrb[14].mxu0  ;;  %v1338_v19 = vsub.s32 %v1327_v33, %v1337_v12 }
 0x187   : > { %v647_v32 = vpop.f32.mrb[15].mxu0  ;;  %vm1365_vm11 = vcmp.ne.s32.totalorder %v1360_v17, 0  ;;  %vm1368_vm12 = vcmp.lt.s32.totalorder %v1360_v17, 0  ;;  %v1435_v31 = vld [vmem:[%s2138_s4 + $0x8] sm:$0xff] }
 0x188   : > { %vm1363_vm13 = vcmp.ne.s32.totalorder %v1338_v19, 0  ;;  %vm1366_vm14 = vcmp.lt.s32.totalorder %v1338_v19, 0  ;;  %vm2039_vm1 = vmand %vm1368_vm12, %vm1365_vm11  ;;  %v1372_v33 = vadd.s32 18, %v1338_v19 }
 0x189   : > { %v808_v34 = vpop.f32.mrb[16].mxu1  ;;  %vm2043_vm2 = vmand %vm1366_vm14, %vm1363_vm13 }
 0x18a   : > { %v816_v35 = vadd.f32 %v808_v34, %v691_v23  ;;  %v1606_v36 = vpop.f32.mrb[17].mxu1 }
 0x18b   : > { %v811_v37 = vpop.f32.mrb[18].mxu1 }
 0x18c   : > { %v767_v39 = vpop.f32.mrb[16].mxu0  ;;  %v1607_v40 = vpop.f32.mrb[19].mxu1 }
 0x18d   : > { %v814_v41 = vadd.f32 %v767_v39, %v689_v28  ;;  %v769_v42 = vpop.f32.mrb[17].mxu0  ;;  %v1374_v28 = vadd.s32 18, %v1360_v17  ;;  %v1321_v37 = vpop.permute.xlu0 %1320 }
 0x18e   : > { %v815_v43 = vadd.f32 %v769_v42, %v690_v30  ;;  %v771_v44 = vpop.f32.mrb[18].mxu0 }
 0x18f   : > { %v772_v46 = vpop.f32.mrb[19].mxu0  ;;  %v1377_v39 = vsel %vm2039_vm1, %v1374_v28, %v1360_v17 }
 0x190   : > { %vm1380_vm4 = vcmp.lt.s32.totalorder %v1377_v39, 16 }
 0x191   : > { %v933_v49 = vpop.f32.mrb[20].mxu1 }
 0x192   : > { %v941_v0 = vadd.f32 %v933_v49, %v816_v35  ;;  %v1612_v52 = vpop.f32.mrb[21].mxu1  ;;  %v1373_v35 = vadd.s32 18, %v1349_v22 }
 0x193   : > { %v936_v55 = vpop.f32.mrb[22].mxu1 }
 0x194   : > { %v892_v56 = vpop.f32.mrb[20].mxu0  ;;  %v1613_v57 = vpop.f32.mrb[23].mxu1  ;;  %v1376_v47 = vsel %vm2047_vm3, %v1373_v35, %v1349_v22 }
 0x195   : > { %v939_v58 = vadd.f32 %v892_v56, %v814_v41  ;;  %v894_v59 = vpop.f32.mrb[21].mxu0  ;;  %vm1379_vm6 = vcmp.lt.s32.totalorder %v1376_v47, 16 }
 0x196   : > { %v940_v60 = vadd.f32 %v894_v59, %v815_v43  ;;  %v896_v3 = vpop.f32.mrb[22].mxu0  ;;  %v1375_v43 = vsel %vm2043_vm2, %v1372_v33, %v1338_v19 }
 0x197   : > { %v897_v61 = vpop.f32.mrb[23].mxu0  ;;  %vm1378_vm5 = vcmp.lt.s32.totalorder %v1375_v43, 16 }
 0x199   : > { %v1058_v63 = vpop.f32.mrb[24].mxu1 }
 0x19a   : > { %v1066_v6 = vadd.f32 %v1058_v63, %v941_v0  ;;  %v1618_v2 = vpop.f32.mrb[25].mxu1 }
 0x19b   : > { %v1061_v5 = vpop.f32.mrb[26].mxu1 }
 0x19c   : > { %v1017_v8 = vpop.f32.mrb[24].mxu0  ;;  %v1619_v9 = vpop.f32.mrb[27].mxu1 }
 0x19d   : > { %v1064_v10 = vadd.f32 %v1017_v8, %v939_v58  ;;  %v1019_v11 = vpop.f32.mrb[25].mxu0 }
 0x19e   : > { %v1065_v13 = vadd.f32 %v1019_v11, %v940_v60  ;;  %v1021_v14 = vpop.f32.mrb[26].mxu0 }
 0x19f   : > { %v1022_v16 = vpop.f32.mrb[27].mxu0 }
 0x1a1   : > { %v1183_v18 = vpop.f32.mrb[28].mxu1 }
 0x1a2   : > { %v1191_v20 = vadd.f32 %v1183_v18, %v1066_v6  ;;  %v1624_v21 = vpop.f32.mrb[29].mxu1 }
 0x1a3   : > { %v1186_v23 = vpop.f32.mrb[30].mxu1 }
 0x1a4   : > { %v1142_v24 = vpop.f32.mrb[28].mxu0  ;;  %v1625_v25 = vpop.f32.mrb[31].mxu1 }
 0x1a5   : > { %v1189_v26 = vadd.f32 %v1142_v24, %v1064_v10  ;;  %v1144_v27 = vpop.f32.mrb[29].mxu0  ;;  %v1428_v24 = vld [vmem:[%s2137_s3] sm:$0xff]  ;;  %v1429_v25 = vld [vmem:[%s2137_s3 + $0x8] sm:$0xff] }
 0x1a6   : > { %v1190_v29 = vadd.f32 %v1144_v27, %v1065_v13  ;;  %v1146_v30 = vpop.f32.mrb[30].mxu0 }
 0x1a7   : > { %v1147_v32 = vpop.f32.mrb[31].mxu0  ;;  %v1434_v30 = vld [vmem:[%s2138_s4] sm:$0xff] }
 0x1a8   : > { %v1436_v32 = vld [vmem:[%s2138_s4 + $0x10] sm:$0xff] }
 0x1a9   : > { %v1308_v36 = vpop.f32.mrb[32].mxu1 }
 0x1aa   : > { %v1316_v40 = vadd.f32 %v1308_v36, %v1191_v20  ;;  %v1630_v41 = vpop.f32.mrb[33].mxu1 }
 0x1ab   : > { %v1311_v42 = vpop.f32.mrb[34].mxu1 }
 0x1ac   : > { %v2055_v44 = vadd.f32 %v1321_v37, %v1316_v40  ;;  %v1267_v45 = vpop.f32.mrb[32].mxu0  ;;  %v1631_v46 = vpop.f32.mrb[35].mxu1 }
 0x1ad   : > { %v1314_v48 = vadd.f32 %v1267_v45, %v1189_v26  ;;  %v1269_v49 = vpop.f32.mrb[33].mxu0  ;;  %v1430_v26 = vld [vmem:[%s2137_s3 + $0x10] sm:$0xff] }
 0x1ae   : > { %v1315_v50 = vadd.f32 %v1269_v49, %v1190_v29  ;;  %v1271_v51 = vpop.f32.mrb[34].mxu0  ;;  %v1383_v53 = vsel %vm1380_vm4, %v2055_v44, 0.0 }
 0x1af   : > { %v1323_v0 = vadd.f32 %v1321_v37, %v1314_v48  ;;  %v1272_v52 = vpop.f32.mrb[35].mxu0  ;;  %v1399_v58 = vmul.f32 %v1383_v53, %v2055_v44  ;;  %v1386_v3 = vsel %vm1385_vm7, %v1383_v53, 0.0 }
 0x1b0   : > { %v1324_v54 = vadd.f32 %v1321_v37, %v1315_v50 }
 0x1b1   : > { %v1381_v55 = vsel %vm1378_vm5, %v1323_v0, 0.0  ;;  %v1401_v63 = vsel %vm1385_vm7, %v1399_v58, 0.0 }
 0x1b2   : > { %v1382_v56 = vsel %vm1379_vm6, %v1324_v54, 0.0  ;;  %v1397_v57 = vmul.f32 %v1381_v55, %v1323_v0 }
 0x1b3   : > { %v1384_v59 = vadd.f32 %v1382_v56, %v1381_v55  ;;  %v1398_v60 = vmul.f32 %v1382_v56, %v1324_v54 }
 0x1b5   : > { %v1387_v61 = vadd.f32 %v1386_v3, %v1384_v59  ;;  %v1400_v62 = vadd.f32 %v1398_v60, %v1397_v57 }
 0x1b7   : > { %1388 = vadd.xlane.f32.xlu1 %v1387_v61  ;;  %v1402_v1 = vadd.f32 %v1401_v63, %v1400_v62 }
 0x1b9   : > { %1403 = vadd.xlane.f32.xlu0 %v1402_v1 }
 0x244   : > { %v1389_v6 = vpop.xlane.xlu1 %1388 }
 0x245   : > { %v1390_v2 = vrot.slane %v1389_v6, 4 }
 0x246   : > { %v1404_v4 = vpop.xlane.xlu0 %1403 }
 0x247   : > { %v1391_v5 = vadd.f32 %v1390_v2, %v1389_v6  ;;  %v1405_v7 = vrot.slane %v1404_v4, 4 }
 0x249   : > { %v1392_v8 = vrot.slane %v1391_v5, 2  ;;  %v1406_v9 = vadd.f32 %v1405_v7, %v1404_v4 }
 0x24b   : > { %v1407_v10 = vrot.slane %v1406_v9, 2  ;;  %v1393_v11 = vadd.f32 %v1392_v8, %v1391_v5 }
 0x24d   : > { %v1408_v12 = vadd.f32 %v1407_v10, %v1406_v9  ;;  %v1394_v13 = vrot.slane %v1393_v11, 1 }
 0x24f   : > { %v1395_v14 = vadd.f32 %v1394_v13, %v1393_v11  ;;  %v1409_v15 = vrot.slane %v1408_v12, 1 }
 0x251   : > { %1640 = vpush %v1395_v14  ;;  %v1410_v16 = vadd.f32 %v1409_v15, %v1408_v12 }
 0x253   : > { %1642 = vpush %v1410_v16 }
 0x282   : > { %s1641_s6 = spop %1640 }
 0x283   : > { %s1412_s7 = smul.f32 0.00048828125, %s1641_s6 }
 0x284   : > { %s1643_s8 = spop %1642  ;;  %s1646_s6 = smul.u32 384, %s1837_s22 }
 0x285   : > { %s1414_s9 = smul.f32 %s1412_s7, %s1412_s7  ;;  %v1420_v19 = vstv %s1412_s7 }
 0x286   : > { %s1413_s10 = smul.f32 0.00048828125, %s1643_s8  ;;  %v1421_v20 = vsub.f32 %v1323_v0, %v1420_v19  ;;  %v1422_v21 = vsub.f32 %v1324_v54, %v1420_v19  ;;  %v1423_v22 = vsub.f32 %v2055_v44, %v1420_v19  ;;  %s2089_s23 = scalar_lea.hbm %s2139_s5, %s1646_s6 }
 0x287   : > { %s1715_s6 = scalar_lea.vmem %s1714_s30, 768 }
 0x288   : > { %s1415_s11 = ssub.f32 %s1413_s10, %s1414_s9 }
 0x28a   : > { %s1416_s12 = sadd.f32 1e-05, %s1415_s11 }
 0x28c   : > { %v1417_v17 = vstv %s1416_s12 }
 0x28d   : > { %1707 = vrsqrt.f32 %v1417_v17 }
 0x297   : > { %v1708_v18 = vpop.eup %1707 }
 0x298   : > { %1644 = vpush %v1708_v18 }
 0x2c9   : > { %s1645_s15 = spop %1644 }
 0x2ca   : > { %v1424_v23 = vstv %s1645_s15  ;;  %s217_s15 = scalar_lea.vmem [#allocation2], %s1632_s14  ;;  %s1444_s14 = scalar_lea.sflag [#allocation3], %s215_s13 }
 0x2cb   : > { %v1425_v27 = vmul.f32 %v1424_v23, %v1421_v20  ;;  %v1426_v28 = vmul.f32 %v1424_v23, %v1422_v21  ;;  %v1427_v29 = vmul.f32 %v1424_v23, %v1423_v22  ;;  %s1458_s16 = sshll.u32 %s217_s15, 4  ;;  %s2091_s16 = int_to_ptr.vmem [resolvable:$true] %s1458_s16 }
 0x2cc   : > { %s1709_s25 = scalar_lea.vmem %s2091_s16, 384  ;;  %p1716_p0 = scmp.lt.s32.totalorder %s2091_s16, %s1714_s30 }
 0x2cd   : > { %v1431_v33 = vmul.f32 %v1428_v24, %v1425_v27  ;;  %v1432_v34 = vmul.f32 %v1429_v25, %v1426_v28  ;;  %v1433_v35 = vmul.f32 %v1430_v26, %v1427_v29  ;;  %p1710_p11 = scmp.ne.s32.totalorder %s2091_s16, %s1709_s25  ;;  %p1717_p1 = scmp.lt.s32.totalorder %s1715_s6, %s1709_s25 }
 0x2cf   : > { %v1437_v36 = vadd.f32 %v1434_v30, %v1431_v33  ;;  %v1438_v37 = vadd.f32 %v1435_v31, %v1432_v34  ;;  %v1439_v38 = vadd.f32 %v1436_v32, %v1433_v35  ;;  %p1711_p12 = pnand %p1710_p11, %p1854_p5  ;;  %p1718_p2 = por %p1717_p1, %p1716_p0 }
 0x2d1   : > { %1440 = vst [vmem:[%s217_s15] sm:$0xff] %v1437_v36  ;;  %1441 = vst [vmem:[%s217_s15 + $0x8] sm:$0xff] %v1438_v37  ;;  %p1712_p13 = pneg %p1711_p12 }
 0x2d2   : > { %1442 = vst.msk [vmem:[%s217_s15 + $0x10] sm:$0xff] %vm1385_vm7, %v1439_v38 }
 0x2d3   : > { %p1719_p3 = pnand %p1718_p2, %p1712_p13 }
 0x2d5   : > { %1722 = shalt.err (!%p1719_p3)
}
 0x2d6   : > { %s1723_s13 = scalar_lea.hbm %s2089_s23, 384  ;;  %s1727_s9 = scalar_lea.hbm %s2139_s5, 768 }
 0x2d7   : > { %p1724_p4 = scmp.ne.s32.totalorder %s2089_s23, %s1723_s13  ;;  %p1728_p9 = scmp.lt.u32.totalorder %s2089_s23, %s2139_s5 }
 0x2d8   : > { %p1729_p10 = scmp.lt.u32.totalorder %s1727_s9, %s1723_s13  ;;  %p1731_p12 = scmp.lt.u32.totalorder %s1723_s13, %s2089_s23 }
 0x2d9   : > { %p1725_p7 = pnand %p1724_p4, %p1854_p5 }
 0x2da   : > { %p1730_p11 = por %p1729_p10, %p1728_p9 }
 0x2db   : > { %p1726_p8 = pneg %p1725_p7 }
 0x2dc   : > { %p1732_p13 = por %p1731_p12, %p1730_p11 }
 0x2de   : > { %p1733_p0 = pnand %p1732_p13, %p1726_p8 }
 0x2e0   : > { %1736 = shalt.err (!%p1733_p0)
}
 0x2e1   : > { %1647 = dma.vmem_to_hbm [thread:$0]  (%p1854_p5), %s2091_s16, 384, %s2089_s23, %s1444_s14  }
 0x2e2 PF: > { %p1653_p1 = scmp.ge.s32.totalorder %s1771_s21, 2  ;;  %s1470_s12 = sand.u32 1, %s1759_s18  }
 0x2e3   : > { %s1471_s15 = scalar_lea.sflag [#allocation3], %s1470_s12 }
 0x2e4   : > { %p1650_p2 = pnand %p1653_p1, %p1858_p6 }
 0x2e6   : > { %1754 = dma.done.wait (!%p1650_p2), %s1471_s15, 384  }
 0x2e7   : > { %1756 = vsyncadd (!%p1650_p2), %s1471_s15, 4294966912  ;;  %p15_p3 = scmp.ge.s32.totalorder %s1841_s24, 4   ;;  %s2148_s18 = smov %s1763_s19 }
 0x2e8   : > { %s2149_s19 = smov %s1767_s20  ;;  %s2150_s20 = smov %s1852_s27 }
 0x2e9   : > { %s2151_s21 = smov %s1841_s24  ;;  %17 = sbr.rel (!%p15_p3) target bundleno = 3 (0x3), region = 83 }
 0x2f0   :  { %1476 = vsyncpa [#allocation3], 1 }
 0x2f1   :  { %1478 = vsyncpa [#allocation3 + $0x1], 1 }

</bundles_post_ra>
